<compile_context>
chip_gen: v5e
topology: v5e:2x2
jax: 0.10.0
libtpu: 0.0.40
codegen_flags: <defaults>
</compile_context>

<pallas_src>
import jax
import jax.numpy as jnp
from jax import lax
from jax.experimental import pallas as pl
from jax.experimental.pallas import tpu as pltpu


def nonlocal_att_kernel(x_ref, wphi_ref, wtheta_ref, wg_ref, wmask_ref, o_ref):
    x = x_ref[0]                                   # (C, HW) f32
    HW = x.shape[1]
    N = HW // 2

    # ---- 1x1 convs C -> C/2 (bias=False), MXU matmuls -----------------
    phi   = jnp.dot(wphi_ref[...],   x, preferred_element_type=jnp.float32)  # (C/2, HW)
    theta = jnp.dot(wtheta_ref[...], x, preferred_element_type=jnp.float32)  # (C/2, HW)
    g     = jnp.dot(wg_ref[...],     x, preferred_element_type=jnp.float32)  # (C/2, HW)

    # PyTorch .view(b, c, -1): conv channel j -> view channels (2j, 2j+1) =
    # (first half, second half) of its HW positions.  Static lane slices,
    # no in-kernel reshape needed.
    phi_a,   phi_b   = phi[:, :N],   phi[:, N:]
    theta_a, theta_b = theta[:, :N], theta[:, N:]
    g_a,     g_b     = g[:, :N],     g[:, N:]

    # A[i,k] = sum over the C "view" channels of theta_view[c,i]*phi_view[c,k]
    dn_c0 = (((0,), (0,)), ((), ()))               # contract dim 0 of both
    a = (lax.dot_general(theta_a, phi_a, dn_c0, preferred_element_type=jnp.float32)
         + lax.dot_general(theta_b, phi_b, dn_c0, preferred_element_type=jnp.float32))  # (N, N)

    # nn.Softmax(dim=1) on (b, N, N)  ==  softmax over axis 0 of the per-batch A
    m = jnp.max(a, axis=0, keepdims=True)
    e = jnp.exp(a - m)
    a_soft = e * pl.reciprocal(jnp.sum(e, axis=0, keepdims=True), approx=False)

    # Y_even[i,j] = Y[i,2j] = sum_k a_soft[i,k]*g_a[j,k]; Y_odd analogously
    dn_c1 = (((1,), (1,)), ((), ()))               # contract dim 1 of both
    y_even = lax.dot_general(a_soft, g_a, dn_c1, preferred_element_type=jnp.float32)  # (N, C/2)
    y_odd  = lax.dot_general(a_soft, g_b, dn_c1, preferred_element_type=jnp.float32)  # (N, C/2)

    # conv_mask on the viewed-back tensor:
    #   mask[:, :N][ch,i] = sum_j Wmask[ch,j]*Y_even[i,j];  mask[:, N:] from Y_odd
    mask_a = lax.dot_general(wmask_ref[...], y_even, dn_c1,
                             preferred_element_type=jnp.float32)              # (C, N)
    mask_b = lax.dot_general(wmask_ref[...], y_odd,  dn_c1,
                             preferred_element_type=jnp.float32)              # (C, N)

    # ---- residual add, single lane-dense (C, HW) store -----------------
    o_ref[0] = jnp.concatenate([x[:, :N] + mask_a, x[:, N:] + mask_b], axis=1)


def non_local_att_block(x, params):
    """x: (B, C, H, W) float32, NCHW like the PyTorch module."""
    B, C, H, W = x.shape
    HW = H * W
    assert HW % 2 == 0, "module's .view(b, c, -1) requires an even H*W"
    Ci = C // 2
    x_flat = x.reshape(B, C, HW)

    full = lambda b: (0, 0)

    out = pl.pallas_call(
        nonlocal_att_kernel,
        out_shape=jax.ShapeDtypeStruct((B, C, HW), jnp.float32),
        grid_spec=pltpu.PrefetchScalarGridSpec(
            num_scalar_prefetch=0,
            grid=(B,),
            in_specs=[
                pl.BlockSpec((1, C, HW), lambda b: (b, 0, 0)),  # x
                pl.BlockSpec((Ci, C), full),                    # conv_phi weight
                pl.BlockSpec((Ci, C), full),                    # conv_theta weight
                pl.BlockSpec((Ci, C), full),                    # conv_g weight
                pl.BlockSpec((C, Ci), full),                    # conv_mask weight
            ],
            out_specs=pl.BlockSpec((1, C, HW), lambda b: (b, 0, 0)),
        ),
        compiler_params=pltpu.CompilerParams(
            dimension_semantics=("parallel",),
            vmem_limit_bytes=32 << 20),
    )(x_flat, params["w_phi"], params["w_theta"], params["w_g"], params["w_mask"])

    return out.reshape(B, C, H, W)


def reference(x, params):
    """Pure-JAX reference mirroring the PyTorch forward (incl. its .view quirk)."""
    B, C, H, W = x.shape
    HW = H * W
    Ci = C // 2
    xf = x.reshape(B, C, HW)
    phi   = jnp.einsum("oc,bch->boh", params["w_phi"],   xf)     # (B, Ci, HW)
    theta = jnp.einsum("oc,bch->boh", params["w_theta"], xf)
    g     = jnp.einsum("oc,bch->boh", params["w_g"],     xf)
    x_phi   = phi.reshape(B, C, HW // 2)                          # .view(b, c, -1)
    x_theta = theta.reshape(B, C, HW // 2).transpose(0, 2, 1)     # (B, N, C)
    x_g     = g.reshape(B, C, HW // 2).transpose(0, 2, 1)         # (B, N, C)
    a = jnp.einsum("bnc,bck->bnk", x_theta, x_phi)                # (B, N, N)
    a = jax.nn.softmax(a, axis=1)                                 # Softmax(dim=1)
    y = jnp.einsum("bnk,bkc->bnc", a, x_g)                        # (B, N, C)
    mf = y.transpose(0, 2, 1).reshape(B, Ci, HW)                  # permute + view
    mask = jnp.einsum("oc,bch->boh", params["w_mask"], mf)        # (B, C, HW)
    return x + mask.reshape(B, C, H, W)


if __name__ == "__main__":
    B, C, H, W = 2, 4, 16, 16        # channel=4 -> inter_channel=2, HW=256, N=128
    Ci = C // 2

    key = jax.random.PRNGKey(0)
    ks = jax.random.split(key, 5)
    x = jax.random.normal(ks[0], (B, C, H, W), dtype=jnp.float32)

    params = {
        # 1x1 convs, bias=False (weights stored as (out, in))
        "w_phi":   0.1 * jax.random.normal(ks[1], (Ci, C), dtype=jnp.float32),
        "w_theta": 0.1 * jax.random.normal(ks[2], (Ci, C), dtype=jnp.float32),
        "w_g":     0.1 * jax.random.normal(ks[3], (Ci, C), dtype=jnp.float32),
        "w_mask":  0.1 * jax.random.normal(ks[4], (C, Ci), dtype=jnp.float32),
    }

    out = non_local_att_block(x, params)
    out = jax.block_until_ready(out)

    ref = reference(x, params)
    assert out.shape == (B, C, H, W)
    assert jnp.allclose(out, ref, atol=1e-4, rtol=1e-4), "mismatch vs reference"

    print("KERNEL_OK")
</pallas_src>

<mosaic_0001>
module attributes {stable_mosaic.version = 11 : i64} {
  func.func @nonlocal_att_kernel(%arg0: i32, %arg1: memref<1x4x256xf32, #tpu.memory_space<vmem>>, %arg2: memref<2x4xf32, #tpu.memory_space<vmem>>, %arg3: memref<2x4xf32, #tpu.memory_space<vmem>>, %arg4: memref<2x4xf32, #tpu.memory_space<vmem>>, %arg5: memref<4x2xf32, #tpu.memory_space<vmem>>, %arg6: memref<1x4x256xf32, #tpu.memory_space<vmem>>) attributes {dimension_semantics = [#tpu.dimension_semantics<parallel>], iteration_bounds = array<i64: 2>, scalar_prefetch = 0 : i64, scratch_operands = 0 : i64, tpu.core_type = #tpu.core_type<tc>, window_params = [{transform_indices = @transform_0, window_bounds = array<i64: 1, 4, 256>}, {pipeline_mode = #tpu.pipeline_mode<synchronous>, transform_indices = @transform_1, window_bounds = array<i64: 2, 4>}, {pipeline_mode = #tpu.pipeline_mode<synchronous>, transform_indices = @transform_2, window_bounds = array<i64: 2, 4>}, {pipeline_mode = #tpu.pipeline_mode<synchronous>, transform_indices = @transform_3, window_bounds = array<i64: 2, 4>}, {pipeline_mode = #tpu.pipeline_mode<synchronous>, transform_indices = @transform_4, window_bounds = array<i64: 4, 2>}, {transform_indices = @transform_5, window_bounds = array<i64: 1, 4, 256>}]} {
    %c0 = arith.constant 0 : index
    %c0_0 = arith.constant 0 : index
    %c0_1 = arith.constant 0 : index
    %0 = vector.load %arg1[%c0, %c0_0, %c0_1] : memref<1x4x256xf32, #tpu.memory_space<vmem>>, vector<1x4x256xf32>
    %1 = vector.shape_cast %0 : vector<1x4x256xf32> to vector<4x256xf32>
    %c0_2 = arith.constant 0 : index
    %c0_3 = arith.constant 0 : index
    %2 = vector.load %arg2[%c0_2, %c0_3] : memref<2x4xf32, #tpu.memory_space<vmem>>, vector<2x4xf32>
    %cst = arith.constant dense<0.000000e+00> : vector<2x256xf32>
    %3 = tpu.matmul %2, %1, %cst {dimension_numbers = #tpu.dot_dimension_numbers<[1], [0], [0], [1], [0, 0, 1, 1], [], []>} : vector<2x4xf32>, vector<4x256xf32>, vector<2x256xf32> -> vector<2x256xf32>
    %c0_4 = arith.constant 0 : index
    %c0_5 = arith.constant 0 : index
    %4 = vector.load %arg3[%c0_4, %c0_5] : memref<2x4xf32, #tpu.memory_space<vmem>>, vector<2x4xf32>
    %cst_6 = arith.constant dense<0.000000e+00> : vector<2x256xf32>
    %5 = tpu.matmul %4, %1, %cst_6 {dimension_numbers = #tpu.dot_dimension_numbers<[1], [0], [0], [1], [0, 0, 1, 1], [], []>} : vector<2x4xf32>, vector<4x256xf32>, vector<2x256xf32> -> vector<2x256xf32>
    %c0_7 = arith.constant 0 : index
    %c0_8 = arith.constant 0 : index
    %6 = vector.load %arg4[%c0_7, %c0_8] : memref<2x4xf32, #tpu.memory_space<vmem>>, vector<2x4xf32>
    %cst_9 = arith.constant dense<0.000000e+00> : vector<2x256xf32>
    %7 = tpu.matmul %6, %1, %cst_9 {dimension_numbers = #tpu.dot_dimension_numbers<[1], [0], [0], [1], [0, 0, 1, 1], [], []>} : vector<2x4xf32>, vector<4x256xf32>, vector<2x256xf32> -> vector<2x256xf32>
    %8 = vector.extract_strided_slice %3 {offsets = [0, 0], sizes = [2, 128], strides = [1, 1]} : vector<2x256xf32> to vector<2x128xf32>
    %9 = vector.extract_strided_slice %3 {offsets = [0, 128], sizes = [2, 128], strides = [1, 1]} : vector<2x256xf32> to vector<2x128xf32>
    %10 = vector.extract_strided_slice %5 {offsets = [0, 0], sizes = [2, 128], strides = [1, 1]} : vector<2x256xf32> to vector<2x128xf32>
    %11 = vector.extract_strided_slice %5 {offsets = [0, 128], sizes = [2, 128], strides = [1, 1]} : vector<2x256xf32> to vector<2x128xf32>
    %12 = vector.extract_strided_slice %7 {offsets = [0, 0], sizes = [2, 128], strides = [1, 1]} : vector<2x256xf32> to vector<2x128xf32>
    %13 = vector.extract_strided_slice %7 {offsets = [0, 128], sizes = [2, 128], strides = [1, 1]} : vector<2x256xf32> to vector<2x128xf32>
    %cst_10 = arith.constant dense<0.000000e+00> : vector<128x128xf32>
    %14 = tpu.matmul %10, %8, %cst_10 {dimension_numbers = #tpu.dot_dimension_numbers<[0], [0], [1], [1], [0, 1, 1, 1], [], []>} : vector<2x128xf32>, vector<2x128xf32>, vector<128x128xf32> -> vector<128x128xf32>
    %cst_11 = arith.constant dense<0.000000e+00> : vector<128x128xf32>
    %15 = tpu.matmul %11, %9, %cst_11 {dimension_numbers = #tpu.dot_dimension_numbers<[0], [0], [1], [1], [0, 1, 1, 1], [], []>} : vector<2x128xf32>, vector<2x128xf32>, vector<128x128xf32> -> vector<128x128xf32>
    %16 = arith.addf %14, %15 : vector<128x128xf32>
    %cst_12 = arith.constant dense<0xFF800000> : vector<128xf32>
    %17 = vector.multi_reduction <maximumf>, %16, %cst_12 [0] : vector<128x128xf32> to vector<128xf32>
    %18 = vector.shape_cast %17 : vector<128xf32> to vector<1x128xf32>
    %19 = vector.broadcast %18 : vector<1x128xf32> to vector<128x128xf32>
    %20 = arith.subf %16, %19 : vector<128x128xf32>
    %21 = math.exp %20 : vector<128x128xf32>
    %cst_13 = arith.constant dense<0.000000e+00> : vector<128xf32>
    %22 = vector.multi_reduction <add>, %21, %cst_13 [0] : vector<128x128xf32> to vector<128xf32>
    %23 = vector.shape_cast %22 : vector<128xf32> to vector<1x128xf32>
    %24 = tpu.reciprocal %23 : vector<1x128xf32> -> vector<1x128xf32>
    %25 = vector.broadcast %24 : vector<1x128xf32> to vector<128x128xf32>
    %26 = arith.mulf %21, %25 : vector<128x128xf32>
    %cst_14 = arith.constant dense<0.000000e+00> : vector<128x2xf32>
    %27 = tpu.matmul %26, %12, %cst_14 {dimension_numbers = #tpu.dot_dimension_numbers<[1], [1], [0], [0], [0, 0, 1, 0], [], []>} : vector<128x128xf32>, vector<2x128xf32>, vector<128x2xf32> -> vector<128x2xf32>
    %cst_15 = arith.constant dense<0.000000e+00> : vector<128x2xf32>
    %28 = tpu.matmul %26, %13, %cst_15 {dimension_numbers = #tpu.dot_dimension_numbers<[1], [1], [0], [0], [0, 0, 1, 0], [], []>} : vector<128x128xf32>, vector<2x128xf32>, vector<128x2xf32> -> vector<128x2xf32>
    %c0_16 = arith.constant 0 : index
    %c0_17 = arith.constant 0 : index
    %29 = vector.load %arg5[%c0_16, %c0_17] : memref<4x2xf32, #tpu.memory_space<vmem>>, vector<4x2xf32>
    %cst_18 = arith.constant dense<0.000000e+00> : vector<4x128xf32>
    %30 = tpu.matmul %29, %27, %cst_18 {dimension_numbers = #tpu.dot_dimension_numbers<[1], [1], [0], [0], [0, 0, 1, 0], [], []>} : vector<4x2xf32>, vector<128x2xf32>, vector<4x128xf32> -> vector<4x128xf32>
    %c0_19 = arith.constant 0 : index
    %c0_20 = arith.constant 0 : index
    %31 = vector.load %arg5[%c0_19, %c0_20] : memref<4x2xf32, #tpu.memory_space<vmem>>, vector<4x2xf32>
    %cst_21 = arith.constant dense<0.000000e+00> : vector<4x128xf32>
    %32 = tpu.matmul %31, %28, %cst_21 {dimension_numbers = #tpu.dot_dimension_numbers<[1], [1], [0], [0], [0, 0, 1, 0], [], []>} : vector<4x2xf32>, vector<128x2xf32>, vector<4x128xf32> -> vector<4x128xf32>
    %33 = vector.extract_strided_slice %1 {offsets = [0, 0], sizes = [4, 128], strides = [1, 1]} : vector<4x256xf32> to vector<4x128xf32>
    %34 = arith.addf %33, %30 : vector<4x128xf32>
    %35 = vector.extract_strided_slice %1 {offsets = [0, 128], sizes = [4, 128], strides = [1, 1]} : vector<4x256xf32> to vector<4x128xf32>
    %36 = arith.addf %35, %32 : vector<4x128xf32>
    %37 = tpu.concatenate %34, %36 in 1 : vector<4x128xf32>, vector<4x128xf32> -> vector<4x256xf32>
    %c0_22 = arith.constant 0 : index
    %c0_23 = arith.constant 0 : index
    %c0_24 = arith.constant 0 : index
    %38 = vector.load %arg6[%c0_22, %c0_23, %c0_24] : memref<1x4x256xf32, #tpu.memory_space<vmem>>, vector<1x4x256xf32>
    %39 = vector.shape_cast %38 : vector<1x4x256xf32> to vector<4x256xf32>
    %40 = vector.shape_cast %37 : vector<4x256xf32> to vector<1x4x256xf32>
    tpu.vector_store %arg6[%c0_22, %c0_23, %c0_24], %40 {strides = array<i32>} : memref<1x4x256xf32, #tpu.memory_space<vmem>>, vector<1x4x256xf32>,
    return
  }
  func.func @transform_0(%arg0: i32) -> (i32, i32, i32) {
    %c0_i32 = arith.constant 0 : i32
    %c0_i32_0 = arith.constant 0 : i32
    %c0_i32_1 = arith.constant 0 : i32
    return %arg0, %c0_i32, %c0_i32_0 : i32, i32, i32
  }
  func.func @transform_1(%arg0: i32) -> (i32, i32) {
    %c0_i32 = arith.constant 0 : i32
    %c0_i32_0 = arith.constant 0 : i32
    %c0_i32_1 = arith.constant 0 : i32
    return %c0_i32, %c0_i32_0 : i32, i32
  }
  func.func @transform_2(%arg0: i32) -> (i32, i32) {
    %c0_i32 = arith.constant 0 : i32
    %c0_i32_0 = arith.constant 0 : i32
    %c0_i32_1 = arith.constant 0 : i32
    return %c0_i32, %c0_i32_0 : i32, i32
  }
  func.func @transform_3(%arg0: i32) -> (i32, i32) {
    %c0_i32 = arith.constant 0 : i32
    %c0_i32_0 = arith.constant 0 : i32
    %c0_i32_1 = arith.constant 0 : i32
    return %c0_i32, %c0_i32_0 : i32, i32
  }
  func.func @transform_4(%arg0: i32) -> (i32, i32) {
    %c0_i32 = arith.constant 0 : i32
    %c0_i32_0 = arith.constant 0 : i32
    %c0_i32_1 = arith.constant 0 : i32
    return %c0_i32, %c0_i32_0 : i32, i32
  }
  func.func @transform_5(%arg0: i32) -> (i32, i32, i32) {
    %c0_i32 = arith.constant 0 : i32
    %c0_i32_0 = arith.constant 0 : i32
    %c0_i32_1 = arith.constant 0 : i32
    return %arg0, %c0_i32, %c0_i32_0 : i32, i32, i32
  }
}

</mosaic_0001>

<bundles_post_ra>
// kernel: tpu_custom_call.1
= control target key start
LH: loop header
LB: loop body
LE: loop exit
PB: predicated region body
PF: predicated region fallthrough
CT: control target
= control target key end

     0   :  { %10 = vsyncpa [#allocation3], 0  ;;  %s1819_s0 = inlined_call_operand.hbm [shape: f32[2,4,256], index: 0, kind: input, shape index: {}]   ;;  %s1820_s1 = inlined_call_operand.vmem [shape: f32[2,4], index: 1, kind: input, shape index: {}]   ;;  %s1821_s2 = inlined_call_operand.vmem [shape: f32[2,4], index: 2, kind: input, shape index: {}]   ;;  %s1822_s3 = inlined_call_operand.vmem [shape: f32[2,4], index: 3, kind: input, shape index: {}]   ;;  %s1823_s4 = inlined_call_operand.vmem [shape: f32[4,2], index: 4, kind: input, shape index: {}]   ;;  %s1824_s5 = inlined_call_operand.hbm [shape: f32[2,4,256], index: 5, kind: output, shape index: {}]  }
   0x1   :  { %12 = vsyncpa [#allocation3 + $0x1], 0 }
   0x2   :  { %13 = vsyncpa [#allocation4], 0 }
   0x3   :  { %15 = vsyncpa [#allocation4 + $0x1], 0  ;;  %s1490_s18 = smov 0   ;;  %s1492_s19 = smov 0  }
   0x4   :  { %s1494_s20 = smov 0   ;;  %s1496_s21 = smov 0  }
   0x5 LB: > { %s1511_s22 = sadd.s32 4294967295, %s1458_s21   ;;  %s1185_s23 = sadd.s32 4294967294, %s1458_s21   ;;  %s1458_s21 = sphi %s1496_s21, %s1834_s21   ;;  %s1454_s20 = sphi %s1494_s20, %s1833_s20   ;;  %s1450_s19 = sphi %s1492_s19, %s1832_s19   ;;  %s1446_s18 = sphi %s1490_s18, %s1831_s18  }
   0x6   : > { %s1515_s24 = sadd.s32 1, %s1458_s21   ;;  %s28_s25 = sadd.s32 1, %s1454_s20 }
   0x7   : > { %s25_s26 = ssub.s32 %s1458_s21, %s1515_s24  ;;  %p35_p0 = scmp.ne.s32.totalorder %s1454_s20, %s1450_s19 }
   0x8   : > { %p26_p1 = scmp.eq.s32.totalorder %s25_s26, 0  ;;  %p36_p2 = scmp.eq.s32.totalorder %s1458_s21, 0 }
   0x9   : > { %p41_p3 = scmp.ne.s32.totalorder %s1450_s19, %s1446_s18  ;;  %p42_p4 = scmp.eq.s32.totalorder %s1511_s22, 0 }
   0xa   : > { %s1527_s27 = scalar_select %p26_p1, %s1454_s20, %s28_s25  }
   0xb   : > { %p1529_p5 = por %p36_p2, %p35_p0  ;;  %p1533_p6 = por %p42_p4, %p41_p3 }
   0xc   : > { %p149_p7 = scmp.eq.s32.totalorder %s1511_s22, 1  ;;  %p155_p8 = scmp.eq.s32.totalorder %s1185_s23, 1 }
   0xd   : > { %p1293_p10 = scmp.lt.s32.totalorder %s1458_s21, 2  ;;  %s187_s7 = sand.u32 1, %s1454_s20  }
   0xe   : > { %p1540_p11 = por %p149_p7, %p35_p0  ;;  %p1544_p12 = por %p155_p8, %p41_p3 }
   0xf   : > { %s1279_s8 = sshll.u32 %s1458_s21, 3  ;;  %s1188_s9 = sshll.u32 %s187_s7, 3 }
  0x10   : > { %s196_s12 = scalar_lea.hbm %s1819_s0, %s1279_s8  ;;  %s191_s14 = scalar_lea.vmem [#allocation2], %s1188_s9 }
  0x11   : > { %s198_s13 = sshll.u32 %s196_s12, 4  ;;  %s200_s15 = sshll.u32 %s191_s14, 4  ;;  %s199_s13 = int_to_ptr.hbm [resolvable:$true] %s198_s13  ;;  %s201_s15 = int_to_ptr.vmem [resolvable:$true] %s200_s15 }
  0x12   : > { %p1555_p13 = pnand %p1293_p10, %p1529_p5  ;;  %p1191_p0 = scmp.ge.s32.totalorder %s1458_s21, 1 }
  0x13   : > { %p205_p1 = scmp.lt.s32.totalorder %s1458_s21, 3  ;;  %s188_s17 = scalar_lea.sflag [#allocation3], %s187_s7 }
  0x14   : > { %s1362_s23 = sshra.s32 %s199_s13, 4  ;;  %p1366_p3 = pneg %p1555_p13  ;;  %s1363_s23 = int_to_ptr.hbm [resolvable:$true] %s1362_s23 }
  0x15   : > { %s1364_s25 = scalar_lea.hbm %s1363_s23, 8  ;;  %s1369_s28 = scalar_lea.hbm %s1819_s0, 16 }
  0x16   : > { %p1365_p2 = scmp.ne.s32.totalorder %s1363_s23, %s1364_s25  ;;  %p1370_p5 = scmp.lt.s32.totalorder %s1363_s23, %s1819_s0 }
  0x17   : > { %p1371_p8 = scmp.lt.s32.totalorder %s1369_s28, %s1364_s25 }
  0x18   : > { %p1367_p4 = pnand %p1366_p3, %p1365_p2 }
  0x19   : > { %p1372_p10 = por %p1371_p8, %p1370_p5 }
  0x1a   : > { %p1368_p7 = pneg %p1367_p4 }
  0x1c   : > { %p1373_p9 = pnand %p1372_p10, %p1368_p7 }
  0x1e   : > { %1376 = shalt.err (!%p1373_p9)
}
  0x1f   : > { %1288 = dma.hbm_to_vmem [thread:$0]  (!%p1555_p13), %s199_s13, 128, %s201_s15, %s188_s17  }
  0x20   : > { %p206_p2 = pnand %p1191_p0, %p205_p1 }
  0x21   : > { %s1576_s7 = sand.u32 (!%p206_p2), 1, %s1450_s19  }
  0x22   : > { %209 = sbr.rel (%p206_p2) target bundleno = 1277 (0x4fd), region = 40  ;;  %s1192_s11 = sshll.u32 (!%p206_p2), %s1576_s7, 3 }
  0x23   : > { %s212_s12 = scalar_lea.sflag (!%p206_p2), [#allocation3], %s1576_s7  ;;  %s215_s14 = scalar_lea.vmem (!%p206_p2), [#allocation2], %s1192_s11 }
  0x27   : > { %1437 = dma.done.wait (%p1533_p6), %s212_s12, 128  }
  0x28   : > { %1439 = vsyncadd (%p1533_p6), %s212_s12, 4294967168  ;;  %v1586_v0 = vld [vmem:[%s215_s14] sm:$0xff]  ;;  %vm253_vm0 = vcmask 1043456   ;;  %vm249_vm1 = vcmask 31744   ;;  %v298_v3 = vld [vmem:[%s1821_s2] sm:$0x3] }
  0x29   : > { %246 = vst [vmem:[#allocation1] ss:$2 sm:$0xff] %v1586_v0  ;;  %v244_v6 = vld [vmem:[%s1820_s1] sm:$0x3]  ;;  %vm481_vm2 = vcmask 1041408   ;;  %vm432_vm3 = vcmask 15360  }
  0x2a   : > { %s1280_s8 = sshll.u32 %s1511_s22, 3  ;;  %s242_s12 = scalar_lea.vmem [#allocation5], %s1192_s11 }
  0x2b   : > { %s1110_s10 = scalar_lea.hbm %s1824_s5, %s1280_s8  ;;  %s1112_s14 = sshll.u32 %s242_s12, 4  ;;  %s1113_s14 = int_to_ptr.vmem [resolvable:$true] %s1112_s14 }
  0x2c   : > { %s1114_s13 = sshll.u32 %s1110_s10, 4  ;;  %s1099_s22 = scalar_lea.sflag [#allocation4], %s1576_s7  ;;  %s1115_s13 = int_to_ptr.hbm [resolvable:$true] %s1114_s13 }
  0x2d   : > { %s1406_s15 = sshra.s32 %s1115_s13, 4  ;;  %s1412_s11 = scalar_lea.hbm %s1824_s5, 16  ;;  %s1407_s15 = int_to_ptr.hbm [resolvable:$true] %s1406_s15 }
  0x2e   : > { %s1408_s29 = scalar_lea.hbm %s1407_s15, 8  ;;  %p1413_p0 = scmp.lt.s32.totalorder %s1407_s15, %s1824_s5 }
  0x2f   : > { %p1409_p6 = scmp.ne.s32.totalorder %s1407_s15, %s1408_s29  ;;  %p1414_p1 = scmp.lt.s32.totalorder %s1412_s11, %s1408_s29 }
  0x30   : > { %v247_v1 = vld.sshfl [vmem:[#allocation1] sm:$0xff pattern:$0x75316420]  ;;  %v248_v2 = vld.sshfl [vmem:[#allocation1 + $0x8] sm:$0xff pattern:$0x75316420] }
  0x31   : > { %299 = vst [vmem:[#allocation1] ss:$2 sm:$0xff] %v1586_v0  ;;  %1196 = vmatpush.msk.msra.mxu1 %vm253_vm0, %v248_v2  ;;  %1194 = vmatpush.msk.msra.mxu0 %vm253_vm0, %v247_v1  ;;  %p1410_p9 = pnand %p1409_p6, %p1540_p11  ;;  %p1415_p3 = por %p1414_p1, %p1413_p0 }
  0x32   : > { %1197 = vmatmul.msk.f32.vlgmr.msra.gmra.mxu1 %vm249_vm1, %v244_v6  ;;  %1195 = vmatmul.msk.f32.vlgmr.msra.gmra.mxu0 %vm249_vm1, %v244_v6 }
  0x33   : > { %p1411_p13 = pneg %p1410_p9 }
  0x35   : > { %p1416_p4 = pnand %p1415_p3, %p1411_p13 }
  0x38   : > { %v301_v4 = vld.sshfl [vmem:[#allocation1 + $0x8] sm:$0xff pattern:$0x75316420]  ;;  %v300_v5 = vld.sshfl [vmem:[#allocation1] sm:$0xff pattern:$0x75316420] }
  0x39   : > { %1200 = vmatpush.msk.msra.mxu3 %vm253_vm0, %v301_v4  ;;  %1198 = vmatpush.msk.msra.mxu2 %vm253_vm0, %v300_v5  ;;  %350 = vst [vmem:[#allocation1] ss:$2 sm:$0xff] %v1586_v0 }
  0x3a   : > { %1201 = vmatmul.msk.f32.vlgmr.msra.gmra.mxu3 %vm249_vm1, %v298_v3  ;;  %1199 = vmatmul.msk.f32.vlgmr.msra.gmra.mxu2 %vm249_vm1, %v298_v3 }
  0x40   : > { %v351_v4 = vld.sshfl [vmem:[#allocation1] sm:$0xff pattern:$0x75316420]  ;;  %v352_v5 = vld.sshfl [vmem:[#allocation1 + $0x8] sm:$0xff pattern:$0x75316420] }
  0x41   : > { %1202 = vmatpush.msk.msrb.mxu0 %vm253_vm0, %v351_v4  ;;  %1204 = vmatpush.msk.msrb.mxu1 %vm253_vm0, %v352_v5 }
  0xaf   : > { %v295_v9 = vpop.f32.mrf.mxu1  ;;  %v275_v22 = vpop.f32.mrf.mxu0 }
  0xb0   : > { %1206 = vmatpush.msk.msrb.mxu2 %vm481_vm2, %v295_v9  ;;  %1223 = vmatpush.msk.msrb.mxu3 %vm481_vm2, %v275_v22 }
  0xbd   : > { %v346_v7 = vpop.f32.mrf.mxu3  ;;  %v326_v8 = vpop.f32.mrf.mxu2 }
  0xbe   : > { %400 = vxpose.xlu0.b32.start.end [1/1] (short) %v346_v7, 128  ;;  %v349_v7 = vld [vmem:[%s1822_s3] sm:$0x3] }
  0xbf   : > { %1203 = vmatmul.msk.f32.vlgmr.msrb.gmra.mxu0 %vm249_vm1, %v349_v7  ;;  %1205 = vmatmul.msk.f32.vlgmr.msrb.gmra.mxu1 %vm249_vm1, %v349_v7 }
 0x13e   : > { %550 = vxpose.xlu0.b32.start.end [1/1] (short) %v326_v8, 128 }
 0x162   : > { %v416_v10 = vpop.trf.xlu0 }
 0x163   : > { %1207 = vmatmul.msk.f32.vlgmr.msrb.gmra.mxu2 %vm432_vm3, %v416_v10 }
 0x16a   : > { %v417_v11 = vpop.trf.xlu0 }
 0x16b   : > { %1208 = vmatmul.msk.f32.gmra.mxu2 %vm432_vm3, %v417_v11 }
 0x172   : > { %v418_v12 = vpop.trf.xlu0 }
 0x173   : > { %1209 = vmatmul.msk.f32.gmra.mxu2 %vm432_vm3, %v418_v12 }
 0x17a   : > { %v419_v13 = vpop.trf.xlu0 }
 0x17b   : > { %1210 = vmatmul.msk.f32.gmra.mxu2 %vm432_vm3, %v419_v13 }
 0x182   : > { %v420_v14 = vpop.trf.xlu0 }
 0x183   : > { %1211 = vmatmul.msk.f32.gmra.mxu2 %vm432_vm3, %v420_v14 }
 0x18a   : > { %v421_v15 = vpop.trf.xlu0 }
 0x18b   : > { %1212 = vmatmul.msk.f32.gmra.mxu2 %vm432_vm3, %v421_v15 }
 0x192   : > { %v422_v16 = vpop.trf.xlu0 }
 0x193   : > { %1213 = vmatmul.msk.f32.gmra.mxu2 %vm432_vm3, %v422_v16 }
 0x19a   : > { %v423_v17 = vpop.trf.xlu0 }
 0x19b   : > { %1214 = vmatmul.msk.f32.gmra.mxu2 %vm432_vm3, %v423_v17 }
 0x1a2   : > { %v424_v18 = vpop.trf.xlu0 }
 0x1a3   : > { %1215 = vmatmul.msk.f32.gmra.mxu2 %vm432_vm3, %v424_v18 }
 0x1aa   : > { %v425_v19 = vpop.trf.xlu0 }
 0x1ab   : > { %1216 = vmatmul.msk.f32.gmra.mxu2 %vm432_vm3, %v425_v19 }
 0x1b2   : > { %v426_v20 = vpop.trf.xlu0 }
 0x1b3   : > { %1217 = vmatmul.msk.f32.gmra.mxu2 %vm432_vm3, %v426_v20 }
 0x1ba   : > { %v427_v21 = vpop.trf.xlu0 }
 0x1bb   : > { %1218 = vmatmul.msk.f32.gmra.mxu2 %vm432_vm3, %v427_v21 }
 0x1c2   : > { %v428_v23 = vpop.trf.xlu0 }
 0x1c3   : > { %1219 = vmatmul.msk.f32.gmra.mxu2 %vm432_vm3, %v428_v23 }
 0x1ca   : > { %v429_v24 = vpop.trf.xlu0 }
 0x1cb   : > { %1220 = vmatmul.msk.f32.gmra.mxu2 %vm432_vm3, %v429_v24 }
 0x1d2   : > { %v430_v25 = vpop.trf.xlu0 }
 0x1d3   : > { %1221 = vmatmul.msk.f32.gmra.mxu2 %vm432_vm3, %v430_v25 }
 0x1da   : > { %v431_v26 = vpop.trf.xlu0 }
 0x1db   : > { %1222 = vmatmul.msk.f32.gmra.mxu2 %vm432_vm3, %v431_v26 }
 0x1e2   : > { %v566_v27 = vpop.trf.xlu0 }
 0x1e3   : > { %1224 = vmatmul.msk.f32.vlgmr.msrb.gmra.mxu3 %vm432_vm3, %v566_v27 }
 0x1e6   : > { %v502_v40 = vpop.f32.mrf.mxu2 }
 0x1ea   : > { %v567_v28 = vpop.trf.xlu0 }
 0x1eb   : > { %1225 = vmatmul.msk.f32.gmra.mxu3 %vm432_vm3, %v567_v28 }
 0x1ee   : > { %v505_v42 = vpop.f32.mrf.mxu2 }
 0x1f2   : > { %v568_v29 = vpop.trf.xlu0 }
 0x1f3   : > { %1226 = vmatmul.msk.f32.gmra.mxu3 %vm432_vm3, %v568_v29 }
 0x1f6   : > { %v508_v45 = vpop.f32.mrf.mxu2 }
 0x1fa   : > { %v569_v30 = vpop.trf.xlu0 }
 0x1fb   : > { %1227 = vmatmul.msk.f32.gmra.mxu3 %vm432_vm3, %v569_v30 }
 0x1fe   : > { %v511_v46 = vpop.f32.mrf.mxu2 }
 0x202   : > { %v570_v31 = vpop.trf.xlu0 }
 0x203   : > { %1228 = vmatmul.msk.f32.gmra.mxu3 %vm432_vm3, %v570_v31 }
 0x206   : > { %v514_v49 = vpop.f32.mrf.mxu2 }
 0x20a   : > { %v571_v32 = vpop.trf.xlu0 }
 0x20b   : > { %1229 = vmatmul.msk.f32.gmra.mxu3 %vm432_vm3, %v571_v32 }
 0x20e   : > { %v517_v51 = vpop.f32.mrf.mxu2 }
 0x212   : > { %v572_v33 = vpop.trf.xlu0 }
 0x213   : > { %1230 = vmatmul.msk.f32.gmra.mxu3 %vm432_vm3, %v572_v33 }
 0x216   : > { %v520_v53 = vpop.f32.mrf.mxu2 }
 0x21a   : > { %v573_v34 = vpop.trf.xlu0 }
 0x21b   : > { %1231 = vmatmul.msk.f32.gmra.mxu3 %vm432_vm3, %v573_v34 }
 0x21e   : > { %v523_v58 = vpop.f32.mrf.mxu2 }
 0x222   : > { %v574_v35 = vpop.trf.xlu0 }
 0x223   : > { %1232 = vmatmul.msk.f32.gmra.mxu3 %vm432_vm3, %v574_v35 }
 0x226   : > { %v526_v3 = vpop.f32.mrf.mxu2 }
 0x22a   : > { %v575_v36 = vpop.trf.xlu0 }
 0x22b   : > { %1233 = vmatmul.msk.f32.gmra.mxu3 %vm432_vm3, %v575_v36 }
 0x22e   : > { %v529_v9 = vpop.f32.mrf.mxu2 }
 0x232   : > { %v576_v37 = vpop.trf.xlu0 }
 0x233   : > { %1234 = vmatmul.msk.f32.gmra.mxu3 %vm432_vm3, %v576_v37 }
 0x236   : > { %v532_v11 = vpop.f32.mrf.mxu2 }
 0x23a   : > { %v577_v38 = vpop.trf.xlu0 }
 0x23b   : > { %1235 = vmatmul.msk.f32.gmra.mxu3 %vm432_vm3, %v577_v38 }
 0x23e   : > { %v535_v13 = vpop.f32.mrf.mxu2 }
 0x242   : > { %v578_v39 = vpop.trf.xlu0 }
 0x243   : > { %1236 = vmatmul.msk.f32.gmra.mxu3 %vm432_vm3, %v578_v39 }
 0x246   : > { %v538_v16 = vpop.f32.mrf.mxu2 }
 0x24a   : > { %v579_v41 = vpop.trf.xlu0 }
 0x24b   : > { %1237 = vmatmul.msk.f32.gmra.mxu3 %vm432_vm3, %v579_v41 }
 0x24e   : > { %v541_v18 = vpop.f32.mrf.mxu2 }
 0x252   : > { %v580_v43 = vpop.trf.xlu0 }
 0x253   : > { %1238 = vmatmul.msk.f32.gmra.mxu3 %vm432_vm3, %v580_v43 }
 0x256   : > { %v544_v29 = vpop.f32.mrf.mxu2 }
 0x25a   : > { %v581_v44 = vpop.trf.xlu0 }
 0x25b   : > { %1239 = vmatmul.msk.f32.gmra.mxu3 %vm432_vm3, %v581_v44 }
 0x25e   : > { %v547_v37 = vpop.f32.mrf.mxu2 }
 0x266   : > { %v650_v47 = vpop.f32.mrf.mxu3 }
 0x267   : > { %v1639_v55 = vadd.f32 %v650_v47, %v502_v40 }
 0x26e   : > { %v653_v48 = vpop.f32.mrf.mxu3 }
 0x26f   : > { %v1645_v60 = vadd.f32 %v653_v48, %v505_v42 }
 0x276   : > { %v656_v50 = vpop.f32.mrf.mxu3 }
 0x277   : > { %v1651_v1 = vadd.f32 %v656_v50, %v508_v45 }
 0x27e   : > { %v659_v52 = vpop.f32.mrf.mxu3 }
 0x27f   : > { %v660_v32 = vadd.f32 %v659_v52, %v511_v46 }
 0x286   : > { %v662_v54 = vpop.f32.mrf.mxu3 }
 0x287   : > { %v1641_v56 = vadd.f32 %v662_v54, %v514_v49 }
 0x289   : > { %v698_v57 = vmax.f32 %v1639_v55, %v1641_v56 }
 0x28e   : > { %v665_v59 = vpop.f32.mrf.mxu3 }
 0x28f   : > { %v1647_v61 = vadd.f32 %v665_v59, %v517_v51 }
 0x291   : > { %v699_v62 = vmax.f32 %v1645_v60, %v1647_v61 }
 0x296   : > { %v668_v63 = vpop.f32.mrf.mxu3 }
 0x297   : > { %v1653_v2 = vadd.f32 %v668_v63, %v520_v53 }
 0x299   : > { %v700_v6 = vmax.f32 %v1651_v1, %v1653_v2 }
 0x29e   : > { %v671_v8 = vpop.f32.mrf.mxu3 }
 0x29f   : > { %v672_v31 = vadd.f32 %v671_v8, %v523_v58 }
 0x2a1   : > { %v701_v35 = vmax.f32 %v660_v32, %v672_v31 }
 0x2a6   : > { %v674_v10 = vpop.f32.mrf.mxu3 }
 0x2a7   : > { %v1664_v19 = vadd.f32 %v674_v10, %v526_v3 }
 0x2a9   : > { %v702_v23 = vmax.f32 %v698_v57, %v1664_v19 }
 0x2ae   : > { %v677_v12 = vpop.f32.mrf.mxu3 }
 0x2af   : > { %v1666_v20 = vadd.f32 %v677_v12, %v529_v9 }
 0x2b1   : > { %v703_v24 = vmax.f32 %v699_v62, %v1666_v20 }
 0x2b6   : > { %v680_v14 = vpop.f32.mrf.mxu3 }
 0x2b7   : > { %v681_v33 = vadd.f32 %v680_v14, %v532_v11 }
 0x2b9   : > { %v704_v39 = vmax.f32 %v700_v6, %v681_v33 }
 0x2be   : > { %v683_v15 = vpop.f32.mrf.mxu3 }
 0x2bf   : > { %v1676_v34 = vadd.f32 %v683_v15, %v535_v13 }
 0x2c1   : > { %v705_v40 = vmax.f32 %v701_v35, %v1676_v34 }
 0x2c6   : > { %v686_v17 = vpop.f32.mrf.mxu3 }
 0x2c7   : > { %v1668_v21 = vadd.f32 %v686_v17, %v538_v16 }
 0x2c9   : > { %v706_v26 = vmax.f32 %v702_v23, %v1668_v21 }
 0x2ce   : > { %v689_v22 = vpop.f32.mrf.mxu3 }
 0x2cf   : > { %v1672_v25 = vadd.f32 %v689_v22, %v541_v18 }
 0x2d1   : > { %v707_v27 = vmax.f32 %v703_v24, %v1672_v25 }
 0x2d3   : > { %v710_v28 = vmax.f32 %v706_v26, %v707_v27 }
 0x2d6   : > { %v692_v30 = vpop.f32.mrf.mxu3 }
 0x2d7   : > { %v1678_v36 = vadd.f32 %v692_v30, %v544_v29 }
 0x2d9   : > { %v708_v42 = vmax.f32 %v704_v39, %v1678_v36 }
 0x2de   : > { %v695_v38 = vpop.f32.mrf.mxu3 }
 0x2df   : > { %v1681_v41 = vadd.f32 %v695_v38, %v547_v37 }
 0x2e1   : > { %v709_v43 = vmax.f32 %v705_v40, %v1681_v41 }
 0x2e3   : > { %v711_v44 = vmax.f32 %v708_v42, %v709_v43 }
 0x2e5   : > { %v712_v45 = vmax.f32 %v710_v28, %v711_v44 }
 0x2e7   : > { %v713_v46 = vrot.slane %v712_v45, 4 }
 0x2e9   : > { %v714_v47 = vmax.f32 %v712_v45, %v713_v46 }
 0x2eb   : > { %v715_v48 = vrot.slane %v714_v47, 2 }
 0x2ed   : > { %v716_v49 = vmax.f32 %v714_v47, %v715_v48 }
 0x2ef   : > { %v717_v50 = vrot.slane %v716_v49, 1 }
 0x2f1   : > { %v1685_v51 = vmax.f32 %v716_v49, %v717_v50  ;;  %v377_v50 = vpop.f32.mrf.mxu0 }
 0x2f2   : > { %833 = vmatpush.xpose.msra.mxu0 %v377_v50 }
 0x2f3   : > { %v719_v52 = vsub.f32 %v1639_v55, %v1685_v51  ;;  %v720_v53 = vsub.f32 %v1645_v60, %v1685_v51  ;;  %v721_v54 = vsub.f32 %v1651_v1, %v1685_v51  ;;  %v722_v57 = vsub.f32 %v660_v32, %v1685_v51 }
 0x2f4   : > { %v723_v58 = vsub.f32 %v1641_v56, %v1685_v51  ;;  %v724_v59 = vsub.f32 %v1647_v61, %v1685_v51  ;;  %v725_v62 = vsub.f32 %v1653_v2, %v1685_v51  ;;  %v726_v1 = vsub.f32 %v672_v31, %v1685_v51 }
 0x2f5   : > { %v735_v63 = vmul.f32 1.442695, %v719_v52  ;;  %v737_v3 = vmul.f32 1.442695, %v720_v53  ;;  %v739_v55 = vmul.f32 1.442695, %v721_v54  ;;  %v727_v61 = vsub.f32 %v1664_v19, %v1685_v51 }
 0x2f6   : > { %v741_v60 = vmul.f32 1.442695, %v722_v57  ;;  %v743_v4 = vmul.f32 1.442695, %v723_v58  ;;  %v745_v5 = vmul.f32 1.442695, %v724_v59  ;;  %v728_v9 = vsub.f32 %v1666_v20, %v1685_v51 }
 0x2f7   : > { %1328 = vpow2.f32 %v735_v63  ;;  %v747_v2 = vmul.f32 1.442695, %v725_v62  ;;  %v749_v10 = vmul.f32 1.442695, %v726_v1  ;;  %v729_v13 = vsub.f32 %v681_v33, %v1685_v51 }
 0x2f8   : > { %1330 = vpow2.f32 %v737_v3  ;;  %v751_v14 = vmul.f32 1.442695, %v727_v61  ;;  %v730_v17 = vsub.f32 %v1676_v34, %v1685_v51  ;;  %v753_v18 = vmul.f32 1.442695, %v728_v9 }
 0x2f9   : > { %1332 = vpow2.f32 %v739_v55  ;;  %v731_v22 = vsub.f32 %v1668_v21, %v1685_v51  ;;  %v755_v23 = vmul.f32 1.442695, %v729_v13  ;;  %v732_v27 = vsub.f32 %v1672_v25, %v1685_v51 }
 0x2fa   : > { %1334 = vpow2.f32 %v741_v60  ;;  %v757_v28 = vmul.f32 1.442695, %v730_v17  ;;  %v733_v31 = vsub.f32 %v1678_v36, %v1685_v51  ;;  %v734_v34 = vsub.f32 %v1681_v41, %v1685_v51  ;;  %v397_v51 = vpop.f32.mrf.mxu1 }
 0x2fb   : > { %1336 = vpow2.f32 %v743_v4  ;;  %v759_v32 = vmul.f32 1.442695, %v731_v22  ;;  %v761_v35 = vmul.f32 1.442695, %v732_v27  ;;  %898 = vmatpush.xpose.msra.mxu1 %v397_v51 }
 0x2fc   : > { %1338 = vpow2.f32 %v745_v5  ;;  %v763_v25 = vmul.f32 1.442695, %v733_v31  ;;  %v765_v42 = vmul.f32 1.442695, %v734_v34 }
 0x2fd   : > { %v1701_v6 = vpop.eup %1328  ;;  %1340 = vpow2.f32 %v747_v2 }
 0x2fe   : > { %v1703_v56 = vpop.eup %1330  ;;  %1342 = vpow2.f32 %v749_v10 }
 0x2ff   : > { %v767_v7 = vadd.f32 %v1703_v56, %v1701_v6  ;;  %v1709_v8 = vpop.eup %1332  ;;  %1344 = vpow2.f32 %v751_v14 }
 0x300   : > { %v1714_v12 = vpop.eup %1334  ;;  %1346 = vpow2.f32 %v753_v18 }
 0x301   : > { %v768_v11 = vadd.f32 %v1709_v8, %v767_v7  ;;  %v1718_v16 = vpop.eup %1336  ;;  %1348 = vpow2.f32 %v755_v23 }
 0x302   : > { %v1723_v20 = vpop.eup %1338  ;;  %1350 = vpow2.f32 %v757_v28 }
 0x303   : > { %v769_v15 = vadd.f32 %v1714_v12, %v768_v11  ;;  %v1728_v26 = vpop.eup %1340  ;;  %1352 = vpow2.f32 %v759_v32 }
 0x304   : > { %v1343_v30 = vpop.eup %1342  ;;  %1354 = vpow2.f32 %v761_v35 }
 0x305   : > { %v770_v19 = vadd.f32 %v1718_v16, %v769_v15  ;;  %v1345_v33 = vpop.eup %1344  ;;  %1356 = vpow2.f32 %v763_v25 }
 0x306   : > { %v1347_v38 = vpop.eup %1346  ;;  %1358 = vpow2.f32 %v765_v42 }
 0x307   : > { %v771_v24 = vadd.f32 %v1723_v20, %v770_v19  ;;  %v1349_v40 = vpop.eup %1348 }
 0x308   : > { %v1351_v44 = vpop.eup %1350 }
 0x309   : > { %v772_v29 = vadd.f32 %v1728_v26, %v771_v24  ;;  %v1353_v45 = vpop.eup %1352 }
 0x30a   : > { %v1355_v47 = vpop.eup %1354 }
 0x30b   : > { %v773_v21 = vadd.f32 %v1343_v30, %v772_v29  ;;  %v1357_v41 = vpop.eup %1356 }
 0x30c   : > { %v1359_v52 = vpop.eup %1358 }
 0x30d   : > { %v774_v37 = vadd.f32 %v1345_v33, %v773_v21 }
 0x30f   : > { %v775_v39 = vadd.f32 %v1347_v38, %v774_v37 }
 0x311   : > { %v776_v43 = vadd.f32 %v1349_v40, %v775_v39 }
 0x313   : > { %v777_v36 = vadd.f32 %v1351_v44, %v776_v43 }
 0x315   : > { %v778_v46 = vadd.f32 %v1353_v45, %v777_v36 }
 0x317   : > { %v779_v48 = vadd.f32 %v1355_v47, %v778_v46 }
 0x319   : > { %v780_v49 = vadd.f32 %v1357_v41, %v779_v48 }
 0x31b   : > { %v781_v53 = vadd.f32 %v1359_v52, %v780_v49 }
 0x31d   : > { %v782_v54 = vrot.slane %v781_v53, 4 }
 0x31f   : > { %v783_v57 = vadd.f32 %v782_v54, %v781_v53 }
 0x321   : > { %v784_v58 = vrot.slane %v783_v57, 2 }
 0x323   : > { %v785_v59 = vadd.f32 %v784_v58, %v783_v57  ;;  %v948_v57 = vld [vmem:[%s1823_s4] sm:$0xf]  ;;  %v1089_v58 = vrot.slane %v1586_v0, 4 }
 0x325   : > { %v786_v62 = vrot.slane %v785_v59, 1 }
 0x327   : > { %v787_v63 = vadd.f32 %v786_v62, %v785_v59 }
 0x329   : > { %1360 = vrcp.f32 %v787_v63  ;;  %v799_v4 = vand.u32 2147483648, %v787_v63  ;;  %v797_v5 = vand.u32 2147483647, %v787_v63  ;;  %vm793_vm5 = vweird.f32 %v787_v63 }
 0x32b   : > { %v800_v2 = vor.u32 1.1754944e-38, %v799_v4  ;;  %vm798_vm7 = vcmp.eq.f32.partialorder %v797_v5, 8.507059e+37 }
 0x32f   : > { %v1361_v3 = vpop.eup %1360 }
 0x330   : > { %v789_v55 = vmul.f32 %v1361_v3, %v787_v63  ;;  %vm794_vm4 = vweird.f32 %v1361_v3 }
 0x331   : > { %vm795_vm6 = vmor %vm793_vm5, %vm794_vm4 }
 0x332   : > { %v790_v60 = vsub.f32 1.0, %v789_v55 }
 0x334   : > { %v791_v1 = vmul.f32 %v1361_v3, %v790_v60 }
 0x336   : > { %v792_v61 = vadd.f32 %v1361_v3, %v791_v1 }
 0x338   : > { %v796_v7 = vsel %vm795_vm6, %v1361_v3, %v792_v61 }
 0x339   : > { %v801_v9 = vsel %vm798_vm7, %v800_v2, %v796_v7 }
 0x33a   : > { %v802_v10 = vmul.f32 %v1701_v6, %v801_v9  ;;  %v803_v11 = vmul.f32 %v1703_v56, %v801_v9  ;;  %v804_v13 = vmul.f32 %v1709_v8, %v801_v9  ;;  %v805_v14 = vmul.f32 %v1714_v12, %v801_v9 }
 0x33b   : > { %v806_v15 = vmul.f32 %v1718_v16, %v801_v9  ;;  %v807_v17 = vmul.f32 %v1723_v20, %v801_v9  ;;  %v808_v18 = vmul.f32 %v1728_v26, %v801_v9  ;;  %v809_v19 = vmul.f32 %v1343_v30, %v801_v9 }
 0x33c   : > { %834 = vmatmul.f32.vlgmr.msra.gmra.mxu0 %v802_v10  ;;  %899 = vmatmul.f32.vlgmr.msra.gmra.mxu1 %v802_v10  ;;  %v810_v22 = vmul.f32 %v1345_v33, %v801_v9  ;;  %v811_v23 = vmul.f32 %v1347_v38, %v801_v9  ;;  %v812_v24 = vmul.f32 %v1349_v40, %v801_v9 }
 0x33d   : > { %v813_v27 = vmul.f32 %v1351_v44, %v801_v9  ;;  %v814_v6 = vmul.f32 %v1353_v45, %v801_v9  ;;  %v815_v28 = vmul.f32 %v1355_v47, %v801_v9  ;;  %v816_v56 = vmul.f32 %v1357_v41, %v801_v9 }
 0x33e   : > { %v817_v29 = vmul.f32 %v1359_v52, %v801_v9 }
 0x344   : > { %837 = vmatmul.f32.gmra.mxu0 %v803_v11  ;;  %902 = vmatmul.f32.gmra.mxu1 %v803_v11 }
 0x34c   : > { %840 = vmatmul.f32.gmra.mxu0 %v804_v13  ;;  %905 = vmatmul.f32.gmra.mxu1 %v804_v13 }
 0x354   : > { %843 = vmatmul.f32.gmra.mxu0 %v805_v14  ;;  %908 = vmatmul.f32.gmra.mxu1 %v805_v14 }
 0x35c   : > { %846 = vmatmul.f32.gmra.mxu0 %v806_v15  ;;  %911 = vmatmul.f32.gmra.mxu1 %v806_v15 }
 0x364   : > { %849 = vmatmul.f32.gmra.mxu0 %v807_v17  ;;  %914 = vmatmul.f32.gmra.mxu1 %v807_v17 }
 0x36c   : > { %852 = vmatmul.f32.gmra.mxu0 %v808_v18  ;;  %917 = vmatmul.f32.gmra.mxu1 %v808_v18 }
 0x374   : > { %855 = vmatmul.f32.gmra.mxu0 %v809_v19  ;;  %920 = vmatmul.f32.gmra.mxu1 %v809_v19 }
 0x37c   : > { %858 = vmatmul.f32.gmra.mxu0 %v810_v22  ;;  %923 = vmatmul.f32.gmra.mxu1 %v810_v22 }
 0x384   : > { %861 = vmatmul.f32.gmra.mxu0 %v811_v23  ;;  %926 = vmatmul.f32.gmra.mxu1 %v811_v23 }
 0x38c   : > { %864 = vmatmul.f32.gmra.mxu0 %v812_v24  ;;  %929 = vmatmul.f32.gmra.mxu1 %v812_v24 }
 0x394   : > { %867 = vmatmul.f32.gmra.mxu0 %v813_v27  ;;  %932 = vmatmul.f32.gmra.mxu1 %v813_v27 }
 0x39c   : > { %870 = vmatmul.f32.gmra.mxu0 %v814_v6  ;;  %935 = vmatmul.f32.gmra.mxu1 %v814_v6 }
 0x3a4   : > { %873 = vmatmul.f32.gmra.mxu0 %v815_v28  ;;  %938 = vmatmul.f32.gmra.mxu1 %v815_v28 }
 0x3ac   : > { %876 = vmatmul.f32.gmra.mxu0 %v816_v56  ;;  %941 = vmatmul.f32.gmra.mxu1 %v816_v56 }
 0x3b4   : > { %879 = vmatmul.f32.gmra.mxu0 %v817_v29  ;;  %944 = vmatmul.f32.gmra.mxu1 %v817_v29 }
 0x3b9   : > { %v835_v8 = vpop.f32.mrf.mxu0  ;;  %v900_v12 = vpop.f32.mrf.mxu1 }
 0x3c1   : > { %v838_v16 = vpop.f32.mrf.mxu0  ;;  %v903_v20 = vpop.f32.mrf.mxu1 }
 0x3c9   : > { %v841_v26 = vpop.f32.mrf.mxu0  ;;  %v906_v30 = vpop.f32.mrf.mxu1 }
 0x3d1   : > { %v844_v31 = vpop.f32.mrf.mxu0  ;;  %v909_v32 = vpop.f32.mrf.mxu1 }
 0x3d9   : > { %v847_v21 = vpop.f32.mrf.mxu0  ;;  %v912_v33 = vpop.f32.mrf.mxu1 }
 0x3e1   : > { %v850_v34 = vpop.f32.mrf.mxu0  ;;  %v915_v35 = vpop.f32.mrf.mxu1 }
 0x3e9   : > { %v853_v37 = vpop.f32.mrf.mxu0  ;;  %v918_v38 = vpop.f32.mrf.mxu1 }
 0x3f1   : > { %v856_v25 = vpop.f32.mrf.mxu0  ;;  %v921_v39 = vpop.f32.mrf.mxu1 }
 0x3f9   : > { %v859_v40 = vpop.f32.mrf.mxu0  ;;  %v924_v42 = vpop.f32.mrf.mxu1 }
 0x401   : > { %v862_v43 = vpop.f32.mrf.mxu0  ;;  %v927_v44 = vpop.f32.mrf.mxu1 }
 0x409   : > { %v865_v36 = vpop.f32.mrf.mxu0  ;;  %v930_v45 = vpop.f32.mrf.mxu1 }
 0x411   : > { %v868_v46 = vpop.f32.mrf.mxu0  ;;  %v933_v47 = vpop.f32.mrf.mxu1 }
 0x419   : > { %v871_v48 = vpop.f32.mrf.mxu0  ;;  %v936_v41 = vpop.f32.mrf.mxu1 }
 0x421   : > { %v874_v49 = vpop.f32.mrf.mxu0  ;;  %v939_v50 = vpop.f32.mrf.mxu1 }
 0x429   : > { %v877_v51 = vpop.f32.mrf.mxu0  ;;  %v942_v52 = vpop.f32.mrf.mxu1 }
 0x431   : > { %v880_v53 = vpop.f32.mrf.mxu0  ;;  %v945_v54 = vpop.f32.mrf.mxu1 }
 0x432   : > { %1240 = vmatpush.xpose.msk.msra.mxu2 %vm432_vm3, %v880_v53  ;;  %1257 = vmatpush.xpose.msk.msra.mxu3 %vm432_vm3, %v945_v54 }
 0x436   : > { %1241 = vmatpush.xpose.msk.msra.mxu2 %vm432_vm3, %v877_v51  ;;  %1258 = vmatpush.xpose.msk.msra.mxu3 %vm432_vm3, %v942_v52 }
 0x43a   : > { %1242 = vmatpush.xpose.msk.msra.mxu2 %vm432_vm3, %v874_v49  ;;  %1259 = vmatpush.xpose.msk.msra.mxu3 %vm432_vm3, %v939_v50 }
 0x43e   : > { %1243 = vmatpush.xpose.msk.msra.mxu2 %vm432_vm3, %v871_v48  ;;  %1260 = vmatpush.xpose.msk.msra.mxu3 %vm432_vm3, %v936_v41 }
 0x442   : > { %1244 = vmatpush.xpose.msk.msra.mxu2 %vm432_vm3, %v868_v46  ;;  %1261 = vmatpush.xpose.msk.msra.mxu3 %vm432_vm3, %v933_v47 }
 0x446   : > { %1245 = vmatpush.xpose.msk.msra.mxu2 %vm432_vm3, %v865_v36  ;;  %1262 = vmatpush.xpose.msk.msra.mxu3 %vm432_vm3, %v930_v45 }
 0x44a   : > { %1246 = vmatpush.xpose.msk.msra.mxu2 %vm432_vm3, %v862_v43  ;;  %1263 = vmatpush.xpose.msk.msra.mxu3 %vm432_vm3, %v927_v44 }
 0x44e   : > { %1247 = vmatpush.xpose.msk.msra.mxu2 %vm432_vm3, %v859_v40  ;;  %1264 = vmatpush.xpose.msk.msra.mxu3 %vm432_vm3, %v924_v42 }
 0x452   : > { %1248 = vmatpush.xpose.msk.msra.mxu2 %vm432_vm3, %v856_v25  ;;  %1265 = vmatpush.xpose.msk.msra.mxu3 %vm432_vm3, %v921_v39 }
 0x456   : > { %1249 = vmatpush.xpose.msk.msra.mxu2 %vm432_vm3, %v853_v37  ;;  %1266 = vmatpush.xpose.msk.msra.mxu3 %vm432_vm3, %v918_v38 }
 0x45a   : > { %1250 = vmatpush.xpose.msk.msra.mxu2 %vm432_vm3, %v850_v34  ;;  %1267 = vmatpush.xpose.msk.msra.mxu3 %vm432_vm3, %v915_v35 }
 0x45e   : > { %1251 = vmatpush.xpose.msk.msra.mxu2 %vm432_vm3, %v847_v21  ;;  %1268 = vmatpush.xpose.msk.msra.mxu3 %vm432_vm3, %v912_v33 }
 0x462   : > { %1252 = vmatpush.xpose.msk.msra.mxu2 %vm432_vm3, %v844_v31  ;;  %1269 = vmatpush.xpose.msk.msra.mxu3 %vm432_vm3, %v909_v32 }
 0x466   : > { %1253 = vmatpush.xpose.msk.msra.mxu2 %vm432_vm3, %v841_v26  ;;  %1270 = vmatpush.xpose.msk.msra.mxu3 %vm432_vm3, %v906_v30 }
 0x46a   : > { %1254 = vmatpush.xpose.msk.msra.mxu2 %vm432_vm3, %v838_v16  ;;  %1271 = vmatpush.xpose.msk.msra.mxu3 %vm432_vm3, %v903_v20 }
 0x46e   : > { %1255 = vmatpush.xpose.msk.msra.mxu2 %vm432_vm3, %v835_v8  ;;  %1272 = vmatpush.xpose.msk.msra.mxu3 %vm432_vm3, %v900_v12 }
 0x471   : > { %1273 = vmatmul.msk.f32.vlgmr.msra.gmra.mxu3 %vm432_vm3, %v948_v57  ;;  %1256 = vmatmul.msk.f32.vlgmr.msra.gmra.mxu2 %vm432_vm3, %v948_v57 }
 0x4f4   : > { %v1085_v59 = vpop.f32.mrf.mxu3  ;;  %v1017_v62 = vpop.f32.mrf.mxu2 }
 0x4f5   : > { %v1091_v63 = vadd.f32 %v1089_v58, %v1085_v59  ;;  %v1088_v3 = vadd.f32 %v1017_v62, %v1586_v0 }
 0x4f7   : > { %v1094_v55 = vrot.slane %v1091_v63, 4 }
 0x4f9   : > { %v1095_v60 = vsel %vm253_vm0, %v1088_v3, %v1094_v55 }
 0x4fa   : > { %1097 = vst [vmem:[%s242_s12] sm:$0xff] %v1095_v60 }
 0x4fb   : > { %1419 = shalt.err (!%p1416_p4)
}
 0x4fc   : > { %1283 = dma.vmem_to_hbm [thread:$0]  (%p1540_p11), %s1113_s14, 128, %s1115_s13, %s1099_s22  }
 0x4fd PF: > { %s1126_s7 = sand.u32 1, %s1446_s18   ;;  %p1830_p7 = scmp.ge.s32.totalorder %s1458_s21, 2 }
 0x4fe   : > { %s1127_s26 = scalar_lea.sflag [#allocation4], %s1126_s7 }
 0x4ff   : > { %p1290_p5 = pnand %p1830_p7, %p1544_p12 }
 0x501   : > { %p1291_p8 = pneg %p1290_p5 }
 0x503   : > { %1441 = dma.done.wait (%p1291_p8), %s1127_s26, 128  }
 0x504   : > { %1443 = vsyncadd (%p1291_p8), %s1127_s26, 4294967168  ;;  %p18_p10 = scmp.ge.s32.totalorder %s1515_s24, 4   ;;  %s1831_s18 = smov %s1450_s19 }
 0x505   : > { %s1832_s19 = smov %s1454_s20  ;;  %s1833_s20 = smov %s1527_s27 }
 0x506   : > { %s1834_s21 = smov %s1515_s24  ;;  %20 = sbr.rel (!%p18_p10) target bundleno = 5 (0x5), region = 85 }
 0x50b   :  { %1133 = vsyncpa [#allocation3], 1 }
 0x50c   :  { %1135 = vsyncpa [#allocation3 + $0x1], 1 }
 0x50d   :  { %1136 = vsyncpa [#allocation4], 1 }
 0x50e   :  { %1138 = vsyncpa [#allocation4 + $0x1], 1 }

</bundles_post_ra>
